<compile_context>
chip_gen: v7x
topology: tpu7x:2x2x1
jax: 0.10.0
libtpu: 0.0.40
codegen_flags: <defaults>
</compile_context>

<pallas_src>
import functools

import jax
import jax.numpy as jnp
from jax import lax
from jax.experimental import pallas as pl
from jax.experimental.pallas import tpu as pltpu


# ------------------------------- helpers ----------------------------------- #

def _round_up(a, m):
    return ((a + m - 1) // m) * m


def _pick_batch_tile(b, d_pad, k_pad, vmem_budget=24 << 20):
    """Pick a batch tile (multiple of 8) so double-buffered tiles fit the budget."""
    per_row = 4 * 2 * (2 * d_pad + k_pad)        # X + Xhat + z rows, double-buffered, f32
    fixed = 4 * 2 * (k_pad + 1) * d_pad          # Vt + mean, double-buffered, f32
    tb = max(8, (vmem_budget - fixed) // max(per_row, 1))
    tb = max(8, min((int(tb) // 8) * 8, 512))
    if b <= tb:
        return _round_up(b, 8)
    return tb


# ----------------------------- Pallas kernels ------------------------------ #

def _fit_stats_kernel(x_ref, mean_ref, xc_ref, *, inv_b):
    # One pass over X: mean over the (real) batch and the centered matrix.
    x = x_ref[...]
    mean = jnp.sum(x, axis=0, keepdims=True) * inv_b   # padded rows are zero
    mean_ref[...] = mean
    xc_ref[...] = x - mean


def _mean_grid_kernel(x_ref, mean_ref, acc_ref, *, inv_b):
    # Batch-gridded reduction: (1, D) f32 accumulator, init/finalize via pl.when.
    i = pl.program_id(0)

    @pl.when(i == 0)
    def _():
        acc_ref[...] = jnp.zeros_like(acc_ref)

    acc_ref[...] += jnp.sum(x_ref[...], axis=0, keepdims=True)

    @pl.when(i == pl.num_programs(0) - 1)
    def _():
        mean_ref[...] = acc_ref[...] * inv_b


def _encode_decode_kernel(x_ref, mean_ref, vt_ref, z_ref, xhat_ref, *, use_bf16):
    # Fused transform + inverse_transform:
    #   z    = (X - mean) @ Vt[:k].T
    #   Xhat = z @ Vt[:k] + mean
    mean = mean_ref[...]
    xc = x_ref[...] - mean                     # element-wise stays f32 (VPU)
    vt = vt_ref[...]

    if use_bf16:                               # MXU operands only; f32 accumulation
        lhs, vt_m = xc.astype(jnp.bfloat16), vt.astype(jnp.bfloat16)
    else:
        lhs, vt_m = xc, vt

    # A @ B.T without an explicit transpose: contract dim 1 of both operands.
    z = lax.dot_general(
        lhs, vt_m,
        dimension_numbers=(((1,), (1,)), ((), ())),
        preferred_element_type=jnp.float32,
    )                                          # (TB, K_pad)
    z_ref[...] = z

    z_m = z.astype(jnp.bfloat16) if use_bf16 else z
    xhat_ref[...] = (
        jnp.dot(z_m, vt_m, preferred_element_type=jnp.float32) + mean
    )


# ----------------------------- Pallas wrappers ----------------------------- #

def pallas_fit_stats_fused(x_pad, b_real):
    """Single-block fused mean + center: reads X from HBM exactly once."""
    Bp, Dp = x_pad.shape
    kernel = functools.partial(_fit_stats_kernel, inv_b=1.0 / float(b_real))
    return pl.pallas_call(
        kernel,
        out_shape=(jax.ShapeDtypeStruct((1, Dp), jnp.float32),
                   jax.ShapeDtypeStruct((Bp, Dp), jnp.float32)),
        in_specs=[pl.BlockSpec((Bp, Dp), lambda: (0, 0))],
        out_specs=(pl.BlockSpec((1, Dp), lambda: (0, 0)),
                   pl.BlockSpec((Bp, Dp), lambda: (0, 0))),
    )(x_pad)


def pallas_batch_mean_gridded(x_pad, b_real, tb):
    """Batch-gridded mean reduction (for X too large for a single VMEM block)."""
    Bp, Dp = x_pad.shape
    nb = Bp // tb
    kernel = functools.partial(_mean_grid_kernel, inv_b=1.0 / float(b_real))
    return pl.pallas_call(
        kernel,
        out_shape=jax.ShapeDtypeStruct((1, Dp), jnp.float32),
        grid_spec=pltpu.PrefetchScalarGridSpec(
            num_scalar_prefetch=0,
            grid=(nb,),
            in_specs=[pl.BlockSpec((tb, Dp), lambda i: (i, 0))],
            out_specs=pl.BlockSpec((1, Dp), lambda i: (0, 0)),
            scratch_shapes=[pltpu.VMEM((1, Dp), jnp.float32)],
        ),
        compiler_params=pltpu.CompilerParams(
            dimension_semantics=("arbitrary",)),   # reduction axis
    )(x_pad)


def pallas_encode_decode(x_pad, mean_pad, vt_pad, tb, use_bf16=False):
    """Fused transform + inverse_transform, gridded over the batch (parallel)."""
    Bp, Dp = x_pad.shape
    Kp, _ = vt_pad.shape
    nb = Bp // tb
    kernel = functools.partial(_encode_decode_kernel, use_bf16=use_bf16)
    return pl.pallas_call(
        kernel,
        out_shape=(jax.ShapeDtypeStruct((Bp, Kp), jnp.float32),
                   jax.ShapeDtypeStruct((Bp, Dp), jnp.float32)),
        grid_spec=pltpu.PrefetchScalarGridSpec(
            num_scalar_prefetch=0,
            grid=(nb,),
            in_specs=[
                pl.BlockSpec((tb, Dp), lambda i: (i, 0)),   # X tile
                pl.BlockSpec((1, Dp), lambda i: (0, 0)),    # mean (resident)
                pl.BlockSpec((Kp, Dp), lambda i: (0, 0)),   # Vt[:k] padded (resident)
            ],
            out_specs=(
                pl.BlockSpec((tb, Kp), lambda i: (i, 0)),   # z tile
                pl.BlockSpec((tb, Dp), lambda i: (i, 0)),   # Xhat tile
            ),
        ),
        compiler_params=pltpu.CompilerParams(
            dimension_semantics=("parallel",)),   # shard batch across TCs (v7x)
    )(x_pad, mean_pad, vt_pad)


# ------------------------------ PCA forward -------------------------------- #

def svd_flip(u, vt):
    # sign-flip convention identical to the torch staticmethod, with a guard for
    # the degenerate sign==0 case (would otherwise zero a component row).
    max_abs_cols = jnp.argmax(jnp.abs(u), axis=0)                 # (k,)
    signs = jnp.sign(u[max_abs_cols, jnp.arange(u.shape[1])])     # (k,)
    signs = jnp.where(signs == 0, 1.0, signs)
    u = u * signs[None, :]
    vt = vt * signs[:, None]
    return u, vt


def pca_forward(x, n_components=16, use_bf16_matmul=False,
                fused_fit_vmem_limit=8 << 20):
    """Replicates PCA_torch.forward: returns [out, input, z]."""
    assert x.ndim == 3, "Specialized for VAE relevant PCA"
    B, N, C = x.shape
    assert C == 3, "inverse_transform reshapes to (..., 3)"
    D = N * C
    X = x.reshape(B, D).astype(jnp.float32)

    k = min(n_components, B, D)

    # lane-dense padding (multiples of 128 on the feature/component dims,
    # batch padded to the chosen tile so the grid divides evenly)
    D_pad = _round_up(D, 128)
    K_pad = _round_up(k, 128)
    tb = _pick_batch_tile(B, D_pad, K_pad)
    B_pad = _round_up(B, tb)
    X_pad = jnp.zeros((B_pad, D_pad), jnp.float32).at[:B, :D].set(X)

    # --- fit: mean + centering (single HBM pass over X when it fits VMEM) ---
    fused_bytes = 4 * (2 * B_pad * D_pad + D_pad)
    if fused_bytes <= fused_fit_vmem_limit:
        mean_pad, Xc_pad = pallas_fit_stats_fused(X_pad, B)       # one X read
        X_center = Xc_pad[:B, :D]
    else:
        mean_pad = pallas_batch_mean_gridded(X_pad, B, tb)        # gridded reduction
        X_center = X - mean_pad[:, :D]

    # TODO(synk): torch.linalg.svd -> jnp.linalg.svd (no Pallas SVD primitive)
    U, S, Vt = jnp.linalg.svd(X_center, full_matrices=False)
    U, Vt = svd_flip(U, Vt)

    # --- fused transform + inverse_transform (single Pallas kernel) ---
    Vt_pad = jnp.zeros((K_pad, D_pad), jnp.float32).at[:k, :D].set(Vt[:k])
    z_pad, Xhat_pad = pallas_encode_decode(
        X_pad, mean_pad, Vt_pad, tb, use_bf16=use_bf16_matmul)

    z = z_pad[:B, :k]                                             # (B, k)
    out = Xhat_pad[:B, :D].reshape(B, N, 3)                       # (B, N, 3)
    return [out, x, z]


# ---------------------------------- main ------------------------------------ #

if __name__ == "__main__":
    key = jax.random.PRNGKey(0)
    B, N, C = 8, 16, 3          # small shapes consistent with the module (c=3)
    x = jax.random.normal(key, (B, N, C), dtype=jnp.float32)

    out, inp, z = pca_forward(x, n_components=16)
    jax.block_until_ready(out)
    jax.block_until_ready(z)

    # plain-JAX reference of the same math
    X = x.reshape(B, -1)
    mean_ref = jnp.mean(X, axis=0, keepdims=True)
    Xc = X - mean_ref
    U_r, S_r, Vt_r = jnp.linalg.svd(Xc, full_matrices=False)
    U_r, Vt_r = svd_flip(U_r, Vt_r)
    k = min(16, B, X.shape[1])
    z_ref = Xc @ Vt_r[:k].T
    out_ref = (z_ref @ Vt_r[:k] + mean_ref).reshape(B, -1, 3)

    assert jnp.allclose(z, z_ref, atol=1e-4, rtol=1e-4)
    assert jnp.allclose(out, out_ref, atol=1e-4, rtol=1e-4)

    # exercise the batch-gridded mean-reduction fallback path as well
    out2, _, z2 = pca_forward(x, n_components=16, fused_fit_vmem_limit=0)
    jax.block_until_ready(out2)
    assert jnp.allclose(z2, z_ref, atol=1e-4, rtol=1e-4)
    assert jnp.allclose(out2, out_ref, atol=1e-4, rtol=1e-4)

    # exercise the bf16-MXU path (loose check: bf16 operands, f32 accumulation)
    out3, _, z3 = pca_forward(x, n_components=16, use_bf16_matmul=True)
    jax.block_until_ready(out3)
    assert jnp.all(jnp.isfinite(out3)) and jnp.all(jnp.isfinite(z3))

    print("KERNEL_OK")
</pallas_src>

<mosaic_0001>
module attributes {stable_mosaic.version = 11 : i64} {
  func.func @_fit_stats_kernel(%arg0: memref<8x128xf32, #tpu.memory_space<vmem>>, %arg1: memref<1x128xf32, #tpu.memory_space<vmem>>, %arg2: memref<8x128xf32, #tpu.memory_space<vmem>>) attributes {dimension_semantics = [], scalar_prefetch = 0 : i64, scratch_operands = 0 : i64, tpu.core_type = #tpu.core_type<tc>} {
    %c0 = arith.constant 0 : index
    %c0_0 = arith.constant 0 : index
    %0 = vector.load %arg0[%c0, %c0_0] : memref<8x128xf32, #tpu.memory_space<vmem>>, vector<8x128xf32>
    %cst = arith.constant dense<0.000000e+00> : vector<128xf32>
    %1 = vector.multi_reduction <add>, %0, %cst [0] : vector<8x128xf32> to vector<128xf32>
    %2 = vector.shape_cast %1 : vector<128xf32> to vector<1x128xf32>
    %cst_1 = arith.constant 1.250000e-01 : f32
    %3 = vector.broadcast %cst_1 : f32 to vector<1x128xf32>
    %4 = arith.mulf %2, %3 : vector<1x128xf32>
    %c0_2 = arith.constant 0 : index
    %c0_3 = arith.constant 0 : index
    %5 = vector.load %arg1[%c0_2, %c0_3] : memref<1x128xf32, #tpu.memory_space<vmem>>, vector<1x128xf32>
    tpu.vector_store %arg1[%c0_2, %c0_3], %4 {strides = array<i32>} : memref<1x128xf32, #tpu.memory_space<vmem>>, vector<1x128xf32>,
    %6 = vector.broadcast %4 : vector<1x128xf32> to vector<8x128xf32>
    %7 = arith.subf %0, %6 : vector<8x128xf32>
    %c0_4 = arith.constant 0 : index
    %c0_5 = arith.constant 0 : index
    %8 = vector.load %arg2[%c0_4, %c0_5] : memref<8x128xf32, #tpu.memory_space<vmem>>, vector<8x128xf32>
    tpu.vector_store %arg2[%c0_4, %c0_5], %7 {strides = array<i32>} : memref<8x128xf32, #tpu.memory_space<vmem>>, vector<8x128xf32>,
    return
  }
}

</mosaic_0001>

<bundles_post_ra>
// kernel: tpu_custom_call.1
= control target key start
LH: loop header
LB: loop body
LE: loop exit
PB: predicated region body
PF: predicated region fallthrough
CT: control target
= control target key end

     0   :  { %8 = vsyncpa [#allocation3], 0  ;;  %s193_s0 = inlined_call_operand.hbm [shape: f32[8,128], index: 0, kind: input, shape index: {}]   ;;  %s194_s1 = inlined_call_operand.hbm [shape: f32[1,128], index: 1, kind: output, shape index: {0}]   ;;  %s195_s2 = inlined_call_operand.hbm [shape: f32[8,128], index: 2, kind: output, shape index: {1}]  }
   0x1   :  { %9 = vsyncpa [#allocation4], 0 }
   0x2   :  { %10 = vsyncpa [#allocation7], 0  ;;  %s139_s9 = smov [#allocation2]   ;;  %s67_s13 = scalar_lea.hbm %s193_s0, 128 }
   0x3   :  { %s17_s10 = sshll.u32 %s139_s9, 4  ;;  %p68_p0 = scmp.ne.s32.totalorder %s193_s0, %s67_s13  ;;  %s18_s10 = int_to_ptr.vmem [resolvable:$true] %s17_s10 }
   0x4   :  { %p71_p1 = scmp.lt.u32.totalorder %s67_s13, %s193_s0 }
   0x6   :  { %p73_p2 = pnand %p71_p1, %p68_p0 }
   0x8   :  { %76 = shalt.err (!%p73_p2)
}
   0x9   :  { %s77_s18 = scalar_lea.vmem %s18_s10, 128  ;;  %p82_p4 = scmp.lt.s32.totalorder %s18_s10, %s18_s10 }
   0xa   :  { %p78_p3 = scmp.ne.s32.totalorder %s18_s10, %s77_s18  ;;  %p83_p5 = scmp.lt.s32.totalorder %s77_s18, %s77_s18 }
   0xc   :  { %p84_p6 = por %p83_p5, %p82_p4 }
   0xe   :  { %p85_p7 = pnand %p84_p6, %p78_p3 }
  0x10   :  { %88 = shalt.err (!%p85_p7)
}
  0x11   :  { %20 = dma.hbm_to_vmem [thread:$0]  %s193_s0, 128, %s18_s10, [#allocation3]  }
  0x12   :  { %133 = dma.done.wait [#allocation3], 128  }
  0x13   :  { %134 = vsyncadd [#allocation3], 4294967168  ;;  %v24_v0 = vld [vmem:[#allocation2] sm:$0xff]  ;;  %s140_s21 = smov [#allocation5]   ;;  %s141_s23 = smov [#allocation6]  }
  0x14   :  { %v25_v1 = vrot.slane %v24_v0, 4  ;;  %s41_s22 = sshll.u32 %s140_s21, 4  ;;  %s51_s24 = sshll.u32 %s141_s23, 4  ;;  %s42_s22 = int_to_ptr.vmem [resolvable:$true] %s41_s22  ;;  %s52_s24 = int_to_ptr.vmem [resolvable:$true] %s51_s24 }
  0x15   :  { %s89_s25 = scalar_lea.vmem %s42_s22, 16  ;;  %s93_s0 = scalar_lea.vmem %s42_s22, 32 }
  0x16   :  { %v26_v2 = vadd.f32 %v25_v1, %v24_v0  ;;  %p90_p8 = scmp.ne.s32.totalorder %s42_s22, %s89_s25  ;;  %p94_p9 = scmp.lt.s32.totalorder %s42_s22, %s42_s22 }
  0x17   :  { %p95_p10 = scmp.lt.s32.totalorder %s93_s0, %s89_s25 }
  0x18   :  { %v27_v3 = vrot.slane %v26_v2, 2 }
  0x19   :  { %p96_p11 = por %p95_p10, %p94_p9 }
  0x1a   :  { %v28_v4 = vadd.f32 %v27_v3, %v26_v2 }
  0x1b   :  { %p97_p12 = pnand %p96_p11, %p90_p8 }
  0x1c   :  { %v29_v5 = vrot.slane %v28_v4, 1 }
  0x1e   :  { %v30_v6 = vadd.f32 %v29_v5, %v28_v4 }
  0x20   :  { %v31_v7 = vmul.f32 0.125, %v30_v6 }
  0x22   :  { %32 = vst [vmem:[#allocation5] sm:$0x1] %v31_v7  ;;  %v33_v8 = vsub.f32 %v24_v0, %v31_v7 }
  0x23   :  { %100 = shalt.err (!%p97_p12)
}
  0x24   :  { %s101_s28 = scalar_lea.hbm %s194_s1, 16 }
  0x25   :  { %p102_p13 = scmp.ne.s32.totalorder %s194_s1, %s101_s28  ;;  %p105_p0 = scmp.lt.u32.totalorder %s101_s28, %s194_s1 }
  0x27   :  { %p107_p1 = pnand %p105_p0, %p102_p13 }
  0x29   :  { %110 = shalt.err (!%p107_p1)
}
  0x2a   :  { %44 = dma.vmem_to_hbm [thread:$0]  %s42_s22, 16, %s194_s1, [#allocation4]   ;;  %34 = vst [vmem:[#allocation6] sm:$0xff] %v33_v8 }
  0x2b   :  { %s111_s7 = scalar_lea.vmem %s52_s24, 128  ;;  %p116_p3 = scmp.lt.s32.totalorder %s52_s24, %s52_s24 }
  0x2c   :  { %p112_p2 = scmp.ne.s32.totalorder %s52_s24, %s111_s7  ;;  %p117_p4 = scmp.lt.s32.totalorder %s111_s7, %s111_s7 }
  0x2e   :  { %p118_p5 = por %p117_p4, %p116_p3 }
  0x30   :  { %p119_p6 = pnand %p118_p5, %p112_p2 }
  0x32   :  { %122 = shalt.err (!%p119_p6)
}
  0x33   :  { %s123_s10 = scalar_lea.hbm %s195_s2, 128 }
  0x34   :  { %p124_p7 = scmp.ne.s32.totalorder %s195_s2, %s123_s10  ;;  %p127_p8 = scmp.lt.u32.totalorder %s123_s10, %s195_s2 }
  0x36   :  { %p129_p9 = pnand %p127_p8, %p124_p7 }
  0x38   :  { %132 = shalt.err (!%p129_p9)
}
  0x39   :  { %54 = dma.vmem_to_hbm [thread:$0]  %s52_s24, 128, %s195_s2, [#allocation7]  }
  0x3a   :  { %135 = dma.done.wait [#allocation4], 16  }
  0x3b   :  { %136 = vsyncadd [#allocation4], 4294967280 }
  0x3c   :  { %137 = dma.done.wait [#allocation7], 128  }
  0x3d   :  { %138 = vsyncadd [#allocation7], 4294967168 }
  0x3e   :  { %61 = vsyncpa [#allocation3], 1 }
  0x3f   :  { %62 = vsyncpa [#allocation4], 1 }
  0x40   :  { %63 = vsyncpa [#allocation7], 1 }

</bundles_post_ra>
